<compile_context>
chip_gen: v5e
topology: v5e:2x2
jax: 0.10.0
libtpu: 0.0.40
codegen_flags: <defaults>
</compile_context>

<pallas_src>
import functools
import math

import jax
import jax.numpy as jnp
from jax.experimental import pallas as pl
from jax.experimental.pallas import tpu as pltpu

TEMPERATURE = 0.1   # matches NT_Xent.__init__ (beta / tau_plus unused in forward)
_EPS = 1e-8         # torch CosineSimilarity eps
_NEG_BIG = -1e30    # finite "-inf": exp underflows to exactly 0, no inf arithmetic


# --------------------------------------------------------------------------- #
# Pre-pass: normalize, fold sqrt(1/T) into both sides, cast, and pack so that
#   zc[t*2T      : t*2T + T] = sqrt(1/T) * normalize(z_i[t*T:(t+1)*T])
#   zc[t*2T + T  : (t+1)*2T] = sqrt(1/T) * normalize(z_j[t*T:(t+1)*T])
# The main flash loop then reads a single contiguous (2T, D) block per row/col
# tile and its matmul directly produces temperature-scaled cosine similarities.
# --------------------------------------------------------------------------- #
def _normalize_pack_kernel(zi_ref, zj_ref, out_ref, *, tile, scale):
    def _norm(x):
        x = x.astype(jnp.float32)
        sq = jnp.sum(x * x, axis=-1, keepdims=True)
        # == scale * x / max(||x||, eps), as a single EUP rsqrt (zero rows -> 0).
        return (x * jnp.float32(scale)) * jax.lax.rsqrt(
            jnp.maximum(sq, jnp.float32(_EPS * _EPS)))

    out_ref[pl.ds(0, tile), :] = _norm(zi_ref[...]).astype(out_ref.dtype)
    out_ref[pl.ds(tile, tile), :] = _norm(zj_ref[...]).astype(out_ref.dtype)


# --------------------------------------------------------------------------- #
# Main flash loop: per row tile, sweep column tiles with an online logsumexp.
# --------------------------------------------------------------------------- #
def _nt_xent_kernel(q_ref, k_ref, out_ref, m_ref, l_ref, pos_ref, *,
                    tile, pad_cols):
    r = pl.program_id(0)          # row-tile index (parallel)
    c = pl.program_id(1)          # col-tile index (arbitrary, innermost)
    tr = tile

    # ---- per-row-tile init (c is the inner axis, so this runs once per r) ----
    @pl.when(c == 0)
    def _init():
        qi = q_ref[pl.ds(0, tr), :].astype(jnp.float32)
        qj = q_ref[pl.ds(tr, tr), :].astype(jnp.float32)
        # Positive logit sim[i, i+B]/T (1/T already folded in via sqrt on both
        # sides); identical value for the z_i row and the matching z_j row.
        p0 = jnp.sum(qi * qj, axis=-1, keepdims=True)           # (tr, 1)
        pos_ref[pl.ds(0, tr), :] = p0
        pos_ref[pl.ds(tr, tr), :] = p0
        m_ref[...] = jnp.full(m_ref.shape, _NEG_BIG, jnp.float32)
        l_ref[...] = jnp.zeros(l_ref.shape, jnp.float32)

    # (2T, 2T) block of the temperature-scaled cosine-similarity matrix (MXU).
    s = jax.lax.dot_general(q_ref[...], k_ref[...], (((1,), (1,)), ((), ())),
                            preferred_element_type=jnp.float32)

    def _online_lse_update(scores):
        m_prev = m_ref[...]                                      # (2T, 1)
        m_new = jnp.maximum(m_prev, jnp.max(scores, axis=-1, keepdims=True))
        alpha = jnp.exp(m_prev - m_new)
        l_ref[...] = alpha * l_ref[...] + jnp.sum(jnp.exp(scores - m_new),
                                                  axis=-1, keepdims=True)
        m_ref[...] = m_new

    # Off-diagonal tiles: no masking work at all (most of the grid).
    @pl.when(r != c)
    def _off_diag():
        _online_lse_update(s)

    # Diagonal tile only: mask the self-similarity diagonal of this block.
    @pl.when(r == c)
    def _diag():
        rr = jax.lax.broadcasted_iota(jnp.int32, s.shape, 0)
        cc = jax.lax.broadcasted_iota(jnp.int32, s.shape, 1)
        _online_lse_update(jnp.where(rr == cc, jnp.float32(_NEG_BIG), s))

    # ---- finalize: per-row loss for this row tile ----
    @pl.when(c == pl.num_programs(1) - 1)
    def _finalize():
        m = m_ref[...]
        l = l_ref[...]
        if pad_cols:  # static: zero-padded columns each contributed exp(0 - m).
            l = l - jnp.float32(2 * pad_cols) * jnp.exp(-m)
        lse = m + jnp.log(jnp.maximum(l, jnp.float32(1e-30)))
        out_ref[...] = lse - pos_ref[...]                        # (2T, 1)


# --------------------------------------------------------------------------- #
# Wrapper
# --------------------------------------------------------------------------- #
def _round_up(x, m):
    return ((x + m - 1) // m) * m


def _choose_tile(b, tile_cap):
    """Per-view tile: multiple of 8, MXU-friendly (2*tile up to 256 by default),
    and <= ~B/2 so the parallel row axis has >= 2 tiles for v7x megacore."""
    cap = max(8, (int(tile_cap) // 8) * 8)
    half = _round_up(max((b + 1) // 2, 8), 8)
    return min(cap, half)


def nt_xent_loss(z_i, z_j, logit_scale_m=None, *, use_bf16_matmul=True,
                 tile_cap=128):
    """Pallas NT_Xent forward (world_size == 1 semantics).

    logit_scale_m is accepted but unused, exactly like the reference forward.
    use_bf16_matmul=True (default) uses the MXU's native bf16 path with f32
    accumulation; inputs are unit-norm so this is numerically benign.
    tile_cap caps the per-view tile (sweep 64/128 on v5e, keep 128 elsewhere).
    """
    # TODO(synk): world_size > 1 (torch.distributed GatherLayer all-gather) is
    # not implemented; single-device semantics (world_size == 1) are reproduced.
    assert z_i.shape == z_j.shape and z_i.ndim == 2
    b, d = z_i.shape
    n = 2 * b
    tr = _choose_tile(b, tile_cap)
    b_pad = _round_up(b, tr)
    pad = b_pad - b
    num_tiles = b_pad // tr
    compute_dtype = jnp.bfloat16 if use_bf16_matmul else jnp.float32

    if pad:
        z_i = jnp.pad(z_i, ((0, pad), (0, 0)))
        z_j = jnp.pad(z_j, ((0, pad), (0, 0)))

    # ---- one-shot pre-pass: normalize + fold sqrt(1/T) + cast + pack --------
    zc = pl.pallas_call(
        functools.partial(_normalize_pack_kernel, tile=tr,
                          scale=math.sqrt(1.0 / TEMPERATURE)),
        out_shape=jax.ShapeDtypeStruct((2 * b_pad, d), compute_dtype),
        grid_spec=pltpu.PrefetchScalarGridSpec(
            num_scalar_prefetch=0,
            grid=(num_tiles,),
            in_specs=[pl.BlockSpec((tr, d), lambda t: (t, 0)),
                      pl.BlockSpec((tr, d), lambda t: (t, 0))],
            out_specs=pl.BlockSpec((2 * tr, d), lambda t: (t, 0)),
        ),
        compiler_params=pltpu.CompilerParams(
            dimension_semantics=("parallel",)),
    )(z_i, z_j)

    # ---- flash loop: online logsumexp over column tiles ---------------------
    itemsize = 2 if use_bf16_matmul else 4
    vmem_est = (2 * 2 * (2 * tr) * d * itemsize     # 2 inputs, double-buffered
                + 4 * (2 * tr) * (2 * tr) * 4       # score block + exp working set
                + 5 * (2 * tr) * 128 * 4)           # (2T,1) scratch/out, lane-padded
    vmem_limit = int(min(max(2 * vmem_est, 32 * 1024 * 1024), 96 * 1024 * 1024))

    row_losses = pl.pallas_call(
        functools.partial(_nt_xent_kernel, tile=tr, pad_cols=pad),
        out_shape=jax.ShapeDtypeStruct((2 * b_pad, 1), jnp.float32),
        grid_spec=pltpu.PrefetchScalarGridSpec(
            num_scalar_prefetch=0,
            grid=(num_tiles, num_tiles),
            in_specs=[pl.BlockSpec((2 * tr, d), lambda r, c: (r, 0)),   # row tile
                      pl.BlockSpec((2 * tr, d), lambda r, c: (c, 0))],  # col tile
            out_specs=pl.BlockSpec((2 * tr, 1), lambda r, c: (r, 0)),
            scratch_shapes=[pltpu.VMEM((2 * tr, 1), jnp.float32),   # running max
                            pltpu.VMEM((2 * tr, 1), jnp.float32),   # running sum
                            pltpu.VMEM((2 * tr, 1), jnp.float32)],  # positive logits
        ),
        compiler_params=pltpu.CompilerParams(
            dimension_semantics=("parallel", "arbitrary"),
            vmem_limit_bytes=vmem_limit),
    )(zc, zc)

    losses = row_losses[:, 0]
    if pad:
        idx = jnp.arange(2 * b_pad)
        local = idx % (2 * tr)
        row_in_half = jnp.where(local >= tr, local - tr, local)
        valid = (idx // (2 * tr)) * tr + row_in_half < b
        losses = jnp.where(valid, losses, 0.0)
    return jnp.sum(losses) / jnp.float32(n)


# --------------------------------------------------------------------------- #
# Pure-JAX reference mirroring the PyTorch module (world_size == 1).
# --------------------------------------------------------------------------- #
def _nt_xent_reference(z_i, z_j):
    z = jnp.concatenate([z_i, z_j], axis=0).astype(jnp.float32)
    n = z.shape[0]
    b = n // 2
    zn = z / jnp.maximum(jnp.linalg.norm(z, axis=-1, keepdims=True), _EPS)
    sim = jnp.matmul(zn, zn.T, precision=jax.lax.Precision.HIGHEST) / TEMPERATURE
    idx = jnp.arange(n)
    pos = sim[idx, (idx + b) % n]
    sim_masked = jnp.where(jnp.eye(n, dtype=bool), -jnp.inf, sim)
    lse = jax.scipy.special.logsumexp(sim_masked, axis=-1)
    return jnp.sum(lse - pos) / n


if __name__ == "__main__":
    batch_size = 4
    world_size = 1
    dim = 32

    key = jax.random.PRNGKey(0)
    k1, k2, k3, k4 = jax.random.split(key, 4)
    z_i = jax.random.normal(k1, (batch_size * world_size, dim), dtype=jnp.float32)
    z_j = jax.random.normal(k2, (batch_size * world_size, dim), dtype=jnp.float32)
    logit_scale_m = jnp.float32(1.0)  # unused by the forward pass (signature parity)

    # 1) Module-sized shape, f32 MXU path.  B=4 pads to one 8-row tile, so the
    #    padded-row/column handling is exercised even on this tiny case.
    loss = nt_xent_loss(z_i, z_j, logit_scale_m, use_bf16_matmul=False)
    jax.block_until_ready(loss)
    ref = _nt_xent_reference(z_i, z_j)
    assert jnp.allclose(loss, ref, rtol=1e-3, atol=1e-3), (loss, ref)

    # 2) Multi-tile grid with padding: B=20, tile=8 -> 3x3 grid, 4 padded rows.
    #    Exercises the online LSE across column tiles, the gated diagonal mask,
    #    and the padded-column finalize correction.  f32 path.
    z_i2 = jax.random.normal(k3, (20, 64), dtype=jnp.float32)
    z_j2 = jax.random.normal(k4, (20, 64), dtype=jnp.float32)
    ref2 = _nt_xent_reference(z_i2, z_j2)
    loss2 = nt_xent_loss(z_i2, z_j2, logit_scale_m, use_bf16_matmul=False,
                         tile_cap=8)
    jax.block_until_ready(loss2)
    assert jnp.allclose(loss2, ref2, rtol=1e-3, atol=1e-3), (loss2, ref2)

    # 3) Default bf16 MXU path on the multi-tile case (looser tolerance).
    loss3 = nt_xent_loss(z_i2, z_j2, logit_scale_m, tile_cap=8)
    jax.block_until_ready(loss3)
    assert jnp.allclose(loss3, ref2, rtol=5e-2, atol=1e-1), (loss3, ref2)

    # 4) Default tiling / default bf16 path (what most callers hit): tile=16,
    #    2x2 grid, 12 padded rows.
    loss4 = nt_xent_loss(z_i2, z_j2, logit_scale_m)
    jax.block_until_ready(loss4)
    assert jnp.allclose(loss4, ref2, rtol=5e-2, atol=1e-1), (loss4, ref2)

    print("KERNEL_OK")
</pallas_src>

<mosaic_0001>
module attributes {stable_mosaic.version = 11 : i64} {
  func.func @_normalize_pack_kernel(%arg0: i32, %arg1: memref<8x32xf32, #tpu.memory_space<vmem>>, %arg2: memref<8x32xf32, #tpu.memory_space<vmem>>, %arg3: memref<16x32xf32, #tpu.memory_space<vmem>>) attributes {dimension_semantics = [#tpu.dimension_semantics<parallel>], iteration_bounds = array<i64: 1>, scalar_prefetch = 0 : i64, scratch_operands = 0 : i64, tpu.core_type = #tpu.core_type<tc>, window_params = [{transform_indices = @transform_0, window_bounds = array<i64: 8, 32>}, {transform_indices = @transform_1, window_bounds = array<i64: 8, 32>}, {transform_indices = @transform_2, window_bounds = array<i64: 16, 32>}]} {
    %c0 = arith.constant 0 : index
    %c0_0 = arith.constant 0 : index
    %0 = vector.load %arg1[%c0, %c0_0] : memref<8x32xf32, #tpu.memory_space<vmem>>, vector<8x32xf32>
    %1 = arith.mulf %0, %0 : vector<8x32xf32>
    %cst = arith.constant dense<0.000000e+00> : vector<8xf32>
    %2 = vector.multi_reduction <add>, %1, %cst [1] : vector<8x32xf32> to vector<8xf32>
    %3 = vector.shape_cast %2 : vector<8xf32> to vector<8x1xf32>
    %cst_1 = arith.constant 3.1622777 : f32
    %4 = vector.broadcast %cst_1 : f32 to vector<8x32xf32>
    %5 = arith.mulf %0, %4 : vector<8x32xf32>
    %cst_2 = arith.constant 1.000000e-16 : f32
    %6 = vector.broadcast %cst_2 : f32 to vector<8x1xf32>
    %7 = arith.maximumf %3, %6 : vector<8x1xf32>
    %8 = math.rsqrt %7 : vector<8x1xf32>
    %9 = vector.broadcast %8 : vector<8x1xf32> to vector<8x32xf32>
    %10 = arith.mulf %5, %9 : vector<8x32xf32>
    %c0_3 = arith.constant 0 : index
    %c0_4 = arith.constant 0 : index
    %11 = vector.load %arg3[%c0_3, %c0_4] : memref<16x32xf32, #tpu.memory_space<vmem>>, vector<8x32xf32>
    tpu.vector_store %arg3[%c0_3, %c0_4], %10 {strides = array<i32>} : memref<16x32xf32, #tpu.memory_space<vmem>>, vector<8x32xf32>,
    %c0_5 = arith.constant 0 : index
    %c0_6 = arith.constant 0 : index
    %12 = vector.load %arg2[%c0_5, %c0_6] : memref<8x32xf32, #tpu.memory_space<vmem>>, vector<8x32xf32>
    %13 = arith.mulf %12, %12 : vector<8x32xf32>
    %cst_7 = arith.constant dense<0.000000e+00> : vector<8xf32>
    %14 = vector.multi_reduction <add>, %13, %cst_7 [1] : vector<8x32xf32> to vector<8xf32>
    %15 = vector.shape_cast %14 : vector<8xf32> to vector<8x1xf32>
    %cst_8 = arith.constant 3.1622777 : f32
    %16 = vector.broadcast %cst_8 : f32 to vector<8x32xf32>
    %17 = arith.mulf %12, %16 : vector<8x32xf32>
    %cst_9 = arith.constant 1.000000e-16 : f32
    %18 = vector.broadcast %cst_9 : f32 to vector<8x1xf32>
    %19 = arith.maximumf %15, %18 : vector<8x1xf32>
    %20 = math.rsqrt %19 : vector<8x1xf32>
    %21 = vector.broadcast %20 : vector<8x1xf32> to vector<8x32xf32>
    %22 = arith.mulf %17, %21 : vector<8x32xf32>
    %c8 = arith.constant 8 : index
    %c0_10 = arith.constant 0 : index
    %23 = vector.load %arg3[%c8, %c0_10] : memref<16x32xf32, #tpu.memory_space<vmem>>, vector<8x32xf32>
    tpu.vector_store %arg3[%c8, %c0_10], %22 {strides = array<i32>} : memref<16x32xf32, #tpu.memory_space<vmem>>, vector<8x32xf32>,
    return
  }
  func.func @transform_0(%arg0: i32) -> (i32, i32) {
    %c0_i32 = arith.constant 0 : i32
    %c0_i32_0 = arith.constant 0 : i32
    return %arg0, %c0_i32 : i32, i32
  }
  func.func @transform_1(%arg0: i32) -> (i32, i32) {
    %c0_i32 = arith.constant 0 : i32
    %c0_i32_0 = arith.constant 0 : i32
    return %arg0, %c0_i32 : i32, i32
  }
  func.func @transform_2(%arg0: i32) -> (i32, i32) {
    %c0_i32 = arith.constant 0 : i32
    %c0_i32_0 = arith.constant 0 : i32
    return %arg0, %c0_i32 : i32, i32
  }
}

</mosaic_0001>

<bundles_post_ra>
// kernel: tpu_custom_call.1
= control target key start
LH: loop header
LB: loop body
LE: loop exit
PB: predicated region body
PF: predicated region fallthrough
CT: control target
= control target key end

     0   :  { %7 = vsyncpa [#allocation3], 0  ;;  %s219_s0 = inlined_call_operand.hbm [shape: f32[8,32], index: 0, kind: input, shape index: {}]   ;;  %s220_s1 = inlined_call_operand.hbm [shape: f32[8,32], index: 1, kind: input, shape index: {}]   ;;  %s221_s2 = inlined_call_operand.hbm [shape: f32[16,32], index: 2, kind: output, shape index: {}]  }
   0x1   :  { %8 = vsyncpa [#allocation6], 0 }
   0x2   :  { %9 = vsyncpa [#allocation4], 0  ;;  %s15_s11 = sshll.u32 %s219_s0, 4  ;;  %s186_s12 = smov [#allocation2]   ;;  %s16_s11 = int_to_ptr.hbm [resolvable:$true] %s15_s11 }
   0x3   :  { %s17_s13 = sshll.u32 %s186_s12, 4  ;;  %s26_s16 = sshll.u32 %s220_s1, 4  ;;  %s18_s13 = int_to_ptr.vmem [resolvable:$true] %s17_s13  ;;  %s27_s16 = int_to_ptr.hbm [resolvable:$true] %s26_s16 }
   0x4   :  { %20 = dma.hbm_to_vmem [thread:$0]  %s16_s11, 128, %s18_s13, [#allocation3]  }
   0x5   :  { %s187_s17 = smov [#allocation5]  }
   0x6   :  { %s28_s18 = sshll.u32 %s187_s17, 4  ;;  %s29_s18 = int_to_ptr.vmem [resolvable:$true] %s28_s18 }
   0x7   :  { %31 = dma.hbm_to_vmem [thread:$0]  %s27_s16, 128, %s29_s18, [#allocation6]  }
   0x8   :  { %180 = dma.done.wait [#allocation3], 128  }
   0x9   :  { %181 = vsyncadd [#allocation3], 4294967168 }
   0xa   :  { %182 = dma.done.wait [#allocation6], 128  }
   0xb   :  { %183 = vsyncadd [#allocation6], 4294967168  ;;  %v40_v0 = vld [vmem:[#allocation2] sm:$0xff]  ;;  %vm42_vm0 = vcmask 261120   ;;  %v60_v2 = vld [vmem:[#allocation5] sm:$0xff]  ;;  %s188_s0 = smov [#allocation7]  }
   0xc   :  { %v41_v1 = vmul.f32 %v40_v0, %v40_v0  ;;  %v61_v4 = vmul.f32 %v60_v2, %v60_v2  ;;  %v46_v16 = vmul.f32 3.1622777, %v40_v0  ;;  %v65_v24 = vmul.f32 3.1622777, %v60_v2  ;;  %s83_s1 = sshll.u32 %s188_s0, 4  ;;  %s85_s21 = sshll.u32 %s221_s2, 4  ;;  %s84_s1 = int_to_ptr.vmem [resolvable:$true] %s83_s1  ;;  %s86_s21 = int_to_ptr.hbm [resolvable:$true] %s85_s21 }
   0xd   :  { %s189_s22 = smov 128   ;;  %s190_s23 = smov 8  }
   0xe   :  { %v43_v3 = vsel %vm42_vm0, %v41_v1, 0.0  ;;  %v62_v5 = vsel %vm42_vm0, %v61_v4, 0.0 }
   0xf   :  { %44 = vadd.xlane.f32.xlu0 %v43_v3 }
  0x17   :  { %63 = vadd.xlane.f32.xlu0 %v62_v5 }
  0x82   :  { %v45_v6 = vpop.xlane.xlu0 %44 }
  0x83   :  { %v47_v7 = vmax.f32 %v45_v6, 1e-16 }
  0x85   :  { %104 = vrsqrt.f32 %v47_v7  ;;  %vm54_vm2 = vweird.f32 %v47_v7 }
  0x8a   :  { %v64_v8 = vpop.xlane.xlu0 %63 }
  0x8b   :  { %v105_v9 = vpop.eup %104  ;;  %v66_v10 = vmax.f32 %v64_v8, 1e-16 }
  0x8c   :  { %v49_v11 = vmul.f32 %v105_v9, %v47_v7  ;;  %vm55_vm1 = vweird.f32 %v105_v9 }
  0x8d   :  { %106 = vrsqrt.f32 %v66_v10  ;;  %vm56_vm3 = vmor %vm54_vm2, %vm55_vm1  ;;  %vm73_vm5 = vweird.f32 %v66_v10 }
  0x8e   :  { %v50_v12 = vmul.f32 %v105_v9, %v49_v11 }
  0x90   :  { %v51_v13 = vmul.f32 0.5, %v50_v12 }
  0x92   :  { %v52_v14 = vsub.f32 1.5, %v51_v13 }
  0x93   :  { %v107_v15 = vpop.eup %106 }
  0x94   :  { %v53_v17 = vmul.f32 %v105_v9, %v52_v14  ;;  %v68_v18 = vmul.f32 %v107_v15, %v66_v10  ;;  %vm74_vm4 = vweird.f32 %v107_v15 }
  0x95   :  { %vm75_vm6 = vmor %vm73_vm5, %vm74_vm4 }
  0x96   :  { %v57_v19 = vsel %vm56_vm3, %v105_v9, %v53_v17  ;;  %v69_v20 = vmul.f32 %v107_v15, %v68_v18 }
  0x97   :  { %v58_v21 = vmul.f32 %v57_v19, %v46_v16 }
  0x98   :  { %v70_v22 = vmul.f32 0.5, %v69_v20 }
  0x99   :  { %59 = vst.msk [vmem:[#allocation7] sm:$0xff] %vm42_vm0, %v58_v21 }
  0x9a   :  { %v71_v23 = vsub.f32 1.5, %v70_v22 }
  0x9c   :  { %v72_v25 = vmul.f32 %v107_v15, %v71_v23 }
  0x9e   :  { %v76_v26 = vsel %vm75_vm6, %v107_v15, %v72_v25 }
  0x9f   :  { %v77_v27 = vmul.f32 %v76_v26, %v65_v24 }
  0xa1   :  { %78 = vst.msk [vmem:[#allocation7 + $0x8] sm:$0xff] %vm42_vm0, %v77_v27 }
  0xa2   :  { %91 = dma.vmem_to_hbm [thread:$0]  %s84_s1, 256, %s86_s21, [#allocation4], %s189_s22, %s189_s22, %s190_s23  }
  0xa3   :  { %184 = dma.done.wait [#allocation4], 256  }
  0xa4   :  { %185 = vsyncadd [#allocation4], 4294967040 }
  0xa5   :  { %96 = vsyncpa [#allocation3], 1 }
  0xa6   :  { %97 = vsyncpa [#allocation6], 1 }
  0xa7   :  { %98 = vsyncpa [#allocation4], 1 }

</bundles_post_ra>
